<compile_context>
chip_gen: v7x
topology: tpu7x:2x2x1
jax: 0.10.0
libtpu: 0.0.40
codegen_flags: <defaults>
</compile_context>

<pallas_src>
import functools
import math

import jax
import jax.numpy as jnp
from jax.experimental import pallas as pl
from jax.experimental.pallas import tpu as pltpu


_LN_EPS = 1e-5  # torch.nn.LayerNorm default


def _layer_norm(v):
    """LayerNorm over the last axis, elementwise_affine=False (f32)."""
    mu = jnp.mean(v, axis=-1, keepdims=True)
    c = v - mu
    var = jnp.mean(c * c, axis=-1, keepdims=True)
    return c * jax.lax.rsqrt(var + _LN_EPS)


def _gelu(v):
    # TODO(synk): torch.nn.GELU() defaults to the exact erf formulation; erf has
    # no guaranteed Mosaic lowering, so the tanh approximation is used here (and
    # identically in the pure-JAX reference).
    c = math.sqrt(2.0 / math.pi)
    return 0.5 * v * (1.0 + jnp.tanh(c * (v + 0.044715 * v * v * v)))


def encoder_layer_kernel(x_ref, wq_ref, wk_ref, wv_ref, hmask_ref,
                         w1_ref, b1_ref, w2_ref, b2_ref, o_ref, *, seq_len):
    rows, E = x_ref.shape                      # rows = batch_block * seq_len
    H = hmask_ref.shape[0]
    D = E // H
    bb = rows // seq_len
    scale = 1.0 / math.sqrt(D)

    x = x_ref[...].astype(jnp.float32)         # (rows, E), f32 elementwise math

    # ---- LayerNorm 1 ----
    xn = _layer_norm(x)

    # ---- QKV projections: one lane-dense bf16 MXU matmul each ----
    xn_bf = xn.astype(jnp.bfloat16)
    q = jnp.dot(xn_bf, wq_ref[...], preferred_element_type=jnp.float32)
    k = jnp.dot(xn_bf, wk_ref[...], preferred_element_type=jnp.float32)
    v = jnp.dot(xn_bf, wv_ref[...], preferred_element_type=jnp.float32)

    # bf16 MXU operands for attention; (rows,E)->(bb,T,E) is a free leading split.
    q3 = q.astype(jnp.bfloat16).reshape(bb, seq_len, E)
    k3 = k.astype(jnp.bfloat16).reshape(bb, seq_len, E)
    v3 = v.astype(jnp.bfloat16).reshape(bb, seq_len, E)

    num = jnp.zeros((bb, seq_len, E), jnp.float32)
    den = jnp.zeros((bb, seq_len, E), jnp.float32)
    # TODO(synk): at real ViT sizes (D >= 64, H >= 8) replace the block-diagonal
    # weights + head masks with a batched 'btd,hde->bhte' projection to avoid
    # Hx redundant weight traffic / MXU FLOPs.
    for h in range(H):                         # static unroll, H small
        m = hmask_ref[h]                       # (1, E) 0/1 head mask (bf16)
        # Masking q zeroes the other heads' columns, so the full-width (E)
        # contraction equals the per-head (D) contraction -- no lane slicing.
        s = jnp.einsum('bte,bse->bts', q3 * m, k3,
                       preferred_element_type=jnp.float32) * scale
        p = jnp.exp(s - jnp.max(s, axis=-1, keepdims=True))
        # Unnormalized numerator routed into this head's output columns.
        num = num + jnp.einsum('bts,bse->bte', p.astype(jnp.bfloat16), v3 * m,
                               preferred_element_type=jnp.float32)
        # Per-head denominator broadcast into the same columns (>= 1, safe).
        den = den + jnp.sum(p, axis=-1, keepdims=True) * m.astype(jnp.float32)
    # Single deferred softmax normalization on the (otherwise idle) EUP slot.
    attn = num * pl.reciprocal(den, approx=True)

    res = attn.reshape(rows, E) + x            # residual 1

    # ---- LayerNorm 2 + merger FFN (Linear -> GELU -> Linear) ----
    rn = _layer_norm(res).astype(jnp.bfloat16)
    hid = _gelu(jnp.dot(rn, w1_ref[...],
                        preferred_element_type=jnp.float32) + b1_ref[...])
    y = jnp.dot(hid.astype(jnp.bfloat16), w2_ref[...],
                preferred_element_type=jnp.float32) + b2_ref[...]

    # TODO(synk): with E < 128 this store is a masked (32/128-lane) vst; at real
    # ViT sizes (E a multiple of 128, e.g. 768) this 2-D (rows, E) layout is
    # already lane-dense, so no extra slab reshape is emitted here.
    o_ref[...] = (y + res).astype(o_ref.dtype)  # residual 2


# --------------------------- wrapper-side helpers ---------------------------

def _block_diag(per_head):
    """(H, D, D) per-head matrices -> (H*D, H*D) block-diagonal matrix."""
    H, D, _ = per_head.shape
    eye = jnp.eye(H, dtype=per_head.dtype)
    return jnp.einsum('hij,hg->higj', per_head, eye).reshape(H * D, H * D)


def _vmem_budget_bytes():
    """VMEM budget per grid step: 3/4 of physical VMEM (capped), with headroom.

    v7x (64 MiB physical) automatically gets ~half the v5e/v6e (128 MiB) budget.
    """
    try:
        cap = int(pltpu.get_tpu_info().vmem_capacity_bytes)
    except Exception:
        cap = 64 * 1024 * 1024
    return max(8 << 20, min((cap * 3) // 4, 96 << 20))


def _vmem_bytes_per_step(bb, T, E, F, H):
    """Rough upper bound on live VMEM bytes for one grid step."""
    rows = bb * T
    f32, bf16 = 4, 2
    acts = 10 * rows * E * f32            # x, xn, q, k, v, num, den, res, y, slack
    ffn = 2 * rows * F * f32              # pre-GELU + hidden
    scores = 2 * bb * T * T * f32         # one head's scores/probs (+ margin)
    io = 2 * (2 * rows * E * bf16)        # double-buffered bf16 x-in / out blocks
    weights = (3 * E * E + 2 * E * F) * bf16 + (E + F + H * E) * f32
    return acts + ffn + scores + io + weights


def _auto_batch_block(B, T, E, F, H, budget):
    """Largest batch tile that fits the VMEM budget (maximizes MXU M-dim)."""
    bb = 1
    for cand in range(B, 0, -1):
        if B % cand == 0 and _vmem_bytes_per_step(cand, T, E, F, H) <= budget:
            bb = cand
            break
    # Megacore (v7x): split the batch over the 2 TCs only when each TC still
    # gets >= 256 MXU rows -- never halve an already under-filled MXU.
    if bb == B and B % 2 == 0 and (B // 2) * T >= 256:
        bb = B // 2
    return bb


def encoder_layer(x, wq_heads, wk_heads, wv_heads, w1, b1, w2, b2,
                  *, batch_block=None):
    """Fused EncoderLayer forward (bf16 HBM I/O, bf16 MXU ops, f32 accumulate).

    x                : (B, T, E)   cast to bf16 at the HBM boundary
    w{q,k,v}_heads   : (H, D, D)   per-head projections applied as xh @ W
                       (i.e. the transpose of torch.nn.Linear.weight), no bias
    w1, b1           : (E, F), (F,)  first merger Linear  (x @ w1 + b1)
    w2, b2           : (F, E), (E,)  second merger Linear
    batch_block      : batch rows per grid step; default auto-derived from the
                       VMEM budget (see _auto_batch_block).
    Returns (B, T, E) bf16.
    """
    B, T, E = x.shape
    H, D, _ = wq_heads.shape
    F = w1.shape[1]
    assert H * D == E and w1.shape == (E, F) and w2.shape == (F, E)

    # Wrapper-side layout plumbing (free): 2-D activation slab, block-diagonal
    # bf16 QKV weights, bf16 head masks, f32 2-D biases.
    x2 = x.reshape(B * T, E).astype(jnp.bfloat16)
    wq_bd = _block_diag(wq_heads).astype(jnp.bfloat16)
    wk_bd = _block_diag(wk_heads).astype(jnp.bfloat16)
    wv_bd = _block_diag(wv_heads).astype(jnp.bfloat16)
    hmask = jnp.repeat(jnp.eye(H, dtype=jnp.float32), D,
                       axis=1).reshape(H, 1, E).astype(jnp.bfloat16)
    w1_bf = w1.astype(jnp.bfloat16)
    w2_bf = w2.astype(jnp.bfloat16)
    b1_2 = b1.reshape(1, F).astype(jnp.float32)
    b2_2 = b2.reshape(1, E).astype(jnp.float32)

    vmem_budget = _vmem_budget_bytes()
    if batch_block is None:
        batch_block = _auto_batch_block(B, T, E, F, H, vmem_budget)
    assert B % batch_block == 0
    n_steps = B // batch_block
    rows_blk = batch_block * T

    def _const_spec(shape):
        idx = lambda b: (0,) * len(shape)
        if n_steps > 1:
            # Constant-index operands: the default second pipeline buffer is
            # pure VMEM waste -- single-buffer them.
            return pl.BlockSpec(shape, idx, pipeline_mode=pl.Buffered(1))
        return pl.BlockSpec(shape, idx)

    grid_spec = pltpu.PrefetchScalarGridSpec(
        num_scalar_prefetch=0,
        grid=(n_steps,),
        in_specs=[
            pl.BlockSpec((rows_blk, E), lambda b: (b, 0)),   # x slab (batch rows)
            _const_spec((E, E)),                             # wq (block-diag)
            _const_spec((E, E)),                             # wk
            _const_spec((E, E)),                             # wv
            _const_spec((H, 1, E)),                          # head masks
            _const_spec((E, F)),                             # w1
            _const_spec((1, F)),                             # b1
            _const_spec((F, E)),                             # w2
            _const_spec((1, E)),                             # b2
        ],
        out_specs=pl.BlockSpec((rows_blk, E), lambda b: (b, 0)),
    )

    out2 = pl.pallas_call(
        functools.partial(encoder_layer_kernel, seq_len=T),
        out_shape=jax.ShapeDtypeStruct((B * T, E), jnp.bfloat16),
        grid_spec=grid_spec,
        compiler_params=pltpu.CompilerParams(
            dimension_semantics=("parallel",),
            vmem_limit_bytes=int(vmem_budget)),
    )(x2, wq_bd, wk_bd, wv_bd, hmask, w1_bf, b1_2, w2_bf, b2_2)

    return out2.reshape(B, T, E)


def reference(x, wq_heads, wk_heads, wv_heads, w1, b1, w2, b2):
    """Pure-JAX f32 reference mirroring the PyTorch EncoderLayer structure."""
    x = x.astype(jnp.float32)
    B, T, E = x.shape
    H, D, _ = wq_heads.shape
    hp = jax.lax.Precision.HIGHEST

    xn = _layer_norm(x)
    heads = []
    for h in range(H):
        xh = xn[..., h * D:(h + 1) * D]
        q = jnp.einsum('btd,de->bte', xh, wq_heads[h], precision=hp)
        k = jnp.einsum('btd,de->bte', xh, wk_heads[h], precision=hp)
        v = jnp.einsum('btd,de->bte', xh, wv_heads[h], precision=hp)
        s = jnp.einsum('bte,bse->bts', q, k, precision=hp) / math.sqrt(D)
        p = jax.nn.softmax(s, axis=-1)
        heads.append(jnp.einsum('bts,bse->bte', p, v, precision=hp))
    res = jnp.concatenate(heads, axis=-1) + x

    rn = _layer_norm(res)
    hidden = _gelu(jnp.einsum('bte,ef->btf', rn, w1, precision=hp) + b1)
    return jnp.einsum('btf,fe->bte', hidden, w2, precision=hp) + b2 + res


if __name__ == "__main__":
    # batch, tokens (Token_Dim), Embed_Dim, heads (head_dimension), ff_dim
    B, T, E, H, F = 2, 8, 32, 4, 64
    D = E // H

    key = jax.random.PRNGKey(0)
    ks = jax.random.split(key, 8)
    # bf16 at the HBM boundary (per review); the reference consumes identical values.
    x = jax.random.normal(ks[0], (B, T, E), jnp.float32).astype(jnp.bfloat16)
    wq = (1.0 / math.sqrt(D)) * jax.random.normal(ks[1], (H, D, D), jnp.float32)
    wk = (1.0 / math.sqrt(D)) * jax.random.normal(ks[2], (H, D, D), jnp.float32)
    wv = (1.0 / math.sqrt(D)) * jax.random.normal(ks[3], (H, D, D), jnp.float32)
    w1 = (1.0 / math.sqrt(E)) * jax.random.normal(ks[4], (E, F), jnp.float32)
    b1 = 0.1 * jax.random.normal(ks[5], (F,), jnp.float32)
    w2 = (1.0 / math.sqrt(F)) * jax.random.normal(ks[6], (F, E), jnp.float32)
    b2 = 0.1 * jax.random.normal(ks[7], (E,), jnp.float32)

    out = jax.block_until_ready(encoder_layer(x, wq, wk, wv, w1, b1, w2, b2))
    ref = reference(x, wq, wk, wv, w1, b1, w2, b2)

    assert out.shape == (B, T, E) and out.dtype == jnp.bfloat16
    # bf16 MXU operands + bf16 HBM I/O + approx reciprocal -> compare with a
    # relative Frobenius error instead of the old 1e-4 elementwise tolerance.
    diff = out.astype(jnp.float32) - ref
    rel = float(jnp.sqrt(jnp.sum(diff * diff) / jnp.sum(ref * ref)))
    assert rel < 5e-2, f"kernel != reference (rel err {rel:.4f})"
    print("KERNEL_OK")
</pallas_src>

<mosaic_0001>
module attributes {stable_mosaic.version = 11 : i64} {
  func.func @encoder_layer_kernel(%arg0: i32, %arg1: memref<16x32xbf16, #tpu.memory_space<vmem>>, %arg2: memref<32x32xbf16, #tpu.memory_space<vmem>>, %arg3: memref<32x32xbf16, #tpu.memory_space<vmem>>, %arg4: memref<32x32xbf16, #tpu.memory_space<vmem>>, %arg5: memref<4x1x32xbf16, #tpu.memory_space<vmem>>, %arg6: memref<32x64xbf16, #tpu.memory_space<vmem>>, %arg7: memref<1x64xf32, #tpu.memory_space<vmem>>, %arg8: memref<64x32xbf16, #tpu.memory_space<vmem>>, %arg9: memref<1x32xf32, #tpu.memory_space<vmem>>, %arg10: memref<16x32xbf16, #tpu.memory_space<vmem>>) attributes {dimension_semantics = [#tpu.dimension_semantics<parallel>], iteration_bounds = array<i64: 1>, scalar_prefetch = 0 : i64, scratch_operands = 0 : i64, tpu.core_type = #tpu.core_type<tc>, window_params = [{transform_indices = @transform_0, window_bounds = array<i64: 16, 32>}, {pipeline_mode = #tpu.pipeline_mode<synchronous>, transform_indices = @transform_1, window_bounds = array<i64: 32, 32>}, {pipeline_mode = #tpu.pipeline_mode<synchronous>, transform_indices = @transform_2, window_bounds = array<i64: 32, 32>}, {pipeline_mode = #tpu.pipeline_mode<synchronous>, transform_indices = @transform_3, window_bounds = array<i64: 32, 32>}, {pipeline_mode = #tpu.pipeline_mode<synchronous>, transform_indices = @transform_4, window_bounds = array<i64: 4, 1, 32>}, {pipeline_mode = #tpu.pipeline_mode<synchronous>, transform_indices = @transform_5, window_bounds = array<i64: 32, 64>}, {pipeline_mode = #tpu.pipeline_mode<synchronous>, transform_indices = @transform_6, window_bounds = array<i64: 1, 64>}, {pipeline_mode = #tpu.pipeline_mode<synchronous>, transform_indices = @transform_7, window_bounds = array<i64: 64, 32>}, {pipeline_mode = #tpu.pipeline_mode<synchronous>, transform_indices = @transform_8, window_bounds = array<i64: 1, 32>}, {transform_indices = @transform_9, window_bounds = array<i64: 16, 32>}]} {
    %c0 = arith.constant 0 : index
    %c0_0 = arith.constant 0 : index
    %0 = vector.load %arg1[%c0, %c0_0] : memref<16x32xbf16, #tpu.memory_space<vmem>>, vector<16x32xbf16>
    %1 = arith.extf %0 : vector<16x32xbf16> to vector<16x32xf32>
    %cst = arith.constant dense<0.000000e+00> : vector<16xf32>
    %2 = vector.multi_reduction <add>, %1, %cst [1] : vector<16x32xf32> to vector<16xf32>
    %3 = vector.shape_cast %2 : vector<16xf32> to vector<16x1xf32>
    %cst_1 = arith.constant 3.200000e+01 : f32
    %4 = vector.broadcast %cst_1 : f32 to vector<16x1xf32>
    %5 = arith.divf %3, %4 : vector<16x1xf32>
    %6 = vector.broadcast %5 : vector<16x1xf32> to vector<16x32xf32>
    %7 = arith.subf %1, %6 : vector<16x32xf32>
    %8 = arith.mulf %7, %7 : vector<16x32xf32>
    %cst_2 = arith.constant dense<0.000000e+00> : vector<16xf32>
    %9 = vector.multi_reduction <add>, %8, %cst_2 [1] : vector<16x32xf32> to vector<16xf32>
    %10 = vector.shape_cast %9 : vector<16xf32> to vector<16x1xf32>
    %cst_3 = arith.constant 3.200000e+01 : f32
    %11 = vector.broadcast %cst_3 : f32 to vector<16x1xf32>
    %12 = arith.divf %10, %11 : vector<16x1xf32>
    %cst_4 = arith.constant 9.99999974E-6 : f32
    %13 = vector.broadcast %cst_4 : f32 to vector<16x1xf32>
    %14 = arith.addf %12, %13 : vector<16x1xf32>
    %15 = math.rsqrt %14 : vector<16x1xf32>
    %16 = vector.broadcast %15 : vector<16x1xf32> to vector<16x32xf32>
    %17 = arith.mulf %7, %16 : vector<16x32xf32>
    %18 = arith.truncf %17 : vector<16x32xf32> to vector<16x32xbf16>
    %c0_5 = arith.constant 0 : index
    %c0_6 = arith.constant 0 : index
    %19 = vector.load %arg2[%c0_5, %c0_6] : memref<32x32xbf16, #tpu.memory_space<vmem>>, vector<32x32xbf16>
    %cst_7 = arith.constant dense<0.000000e+00> : vector<16x32xf32>
    %20 = tpu.matmul %18, %19, %cst_7 {dimension_numbers = #tpu.dot_dimension_numbers<[1], [0], [0], [1], [0, 0, 1, 1], [], []>} : vector<16x32xbf16>, vector<32x32xbf16>, vector<16x32xf32> -> vector<16x32xf32>
    %c0_8 = arith.constant 0 : index
    %c0_9 = arith.constant 0 : index
    %21 = vector.load %arg3[%c0_8, %c0_9] : memref<32x32xbf16, #tpu.memory_space<vmem>>, vector<32x32xbf16>
    %cst_10 = arith.constant dense<0.000000e+00> : vector<16x32xf32>
    %22 = tpu.matmul %18, %21, %cst_10 {dimension_numbers = #tpu.dot_dimension_numbers<[1], [0], [0], [1], [0, 0, 1, 1], [], []>} : vector<16x32xbf16>, vector<32x32xbf16>, vector<16x32xf32> -> vector<16x32xf32>
    %c0_11 = arith.constant 0 : index
    %c0_12 = arith.constant 0 : index
    %23 = vector.load %arg4[%c0_11, %c0_12] : memref<32x32xbf16, #tpu.memory_space<vmem>>, vector<32x32xbf16>
    %cst_13 = arith.constant dense<0.000000e+00> : vector<16x32xf32>
    %24 = tpu.matmul %18, %23, %cst_13 {dimension_numbers = #tpu.dot_dimension_numbers<[1], [0], [0], [1], [0, 0, 1, 1], [], []>} : vector<16x32xbf16>, vector<32x32xbf16>, vector<16x32xf32> -> vector<16x32xf32>
    %25 = arith.truncf %20 : vector<16x32xf32> to vector<16x32xbf16>
    %26 = vector.shape_cast %25 : vector<16x32xbf16> to vector<2x8x32xbf16>
    %27 = arith.truncf %22 : vector<16x32xf32> to vector<16x32xbf16>
    %28 = vector.shape_cast %27 : vector<16x32xbf16> to vector<2x8x32xbf16>
    %29 = arith.truncf %24 : vector<16x32xf32> to vector<16x32xbf16>
    %30 = vector.shape_cast %29 : vector<16x32xbf16> to vector<2x8x32xbf16>
    %cst_14 = arith.constant 0.000000e+00 : f32
    %31 = vector.broadcast %cst_14 : f32 to vector<2x8x32xf32>
    %cst_15 = arith.constant 0.000000e+00 : f32
    %32 = vector.broadcast %cst_15 : f32 to vector<2x8x32xf32>
    %c0_16 = arith.constant 0 : index
    %c0_17 = arith.constant 0 : index
    %c0_18 = arith.constant 0 : index
    %33 = vector.load %arg5[%c0_16, %c0_17, %c0_18] : memref<4x1x32xbf16, #tpu.memory_space<vmem>>, vector<1x1x32xbf16>
    %34 = vector.shape_cast %33 : vector<1x1x32xbf16> to vector<1x32xbf16>
    %35 = vector.shape_cast %34 : vector<1x32xbf16> to vector<1x1x32xbf16>
    %36 = vector.broadcast %35 : vector<1x1x32xbf16> to vector<2x8x32xbf16>
    %37 = arith.mulf %26, %36 : vector<2x8x32xbf16>
    "tpu.trace_start"() <{level = 10 : i32, message = "bte,bse->bts"}> : () -> ()
    %cst_19 = arith.constant dense<0.000000e+00> : vector<2x8x8xf32>
    %38 = tpu.matmul %37, %28, %cst_19 {dimension_numbers = #tpu.dot_dimension_numbers<[2], [2], [1], [1], [0, 0, 0, 1, 1, 1], [0], [0]>} : vector<2x8x32xbf16>, vector<2x8x32xbf16>, vector<2x8x8xf32> -> vector<2x8x8xf32>
    "tpu.trace_stop"() : () -> ()
    %cst_20 = arith.constant 0.353553385 : f32
    %39 = vector.broadcast %cst_20 : f32 to vector<2x8x8xf32>
    %40 = arith.mulf %38, %39 : vector<2x8x8xf32>
    %cst_21 = arith.constant dense<0xFF800000> : vector<2x8xf32>
    %41 = vector.multi_reduction <maximumf>, %40, %cst_21 [2] : vector<2x8x8xf32> to vector<2x8xf32>
    %42 = vector.shape_cast %41 : vector<2x8xf32> to vector<2x8x1xf32>
    %43 = vector.broadcast %42 : vector<2x8x1xf32> to vector<2x8x8xf32>
    %44 = arith.subf %40, %43 : vector<2x8x8xf32>
    %45 = math.exp %44 : vector<2x8x8xf32>
    %46 = arith.truncf %45 : vector<2x8x8xf32> to vector<2x8x8xbf16>
    %47 = vector.shape_cast %34 : vector<1x32xbf16> to vector<1x1x32xbf16>
    %48 = vector.broadcast %47 : vector<1x1x32xbf16> to vector<2x8x32xbf16>
    %49 = arith.mulf %30, %48 : vector<2x8x32xbf16>
    "tpu.trace_start"() <{level = 10 : i32, message = "bts,bse->bte"}> : () -> ()
    %cst_22 = arith.constant dense<0.000000e+00> : vector<2x8x32xf32>
    %50 = tpu.matmul %46, %49, %cst_22 {dimension_numbers = #tpu.dot_dimension_numbers<[2], [1], [1], [2], [0, 0, 0, 1, 1, 2], [0], [0]>} : vector<2x8x8xbf16>, vector<2x8x32xbf16>, vector<2x8x32xf32> -> vector<2x8x32xf32>
    "tpu.trace_stop"() : () -> ()
    %51 = arith.addf %31, %50 : vector<2x8x32xf32>
    %cst_23 = arith.constant dense<0.000000e+00> : vector<2x8xf32>
    %52 = vector.multi_reduction <add>, %45, %cst_23 [2] : vector<2x8x8xf32> to vector<2x8xf32>
    %53 = vector.shape_cast %52 : vector<2x8xf32> to vector<2x8x1xf32>
    %54 = arith.extf %34 : vector<1x32xbf16> to vector<1x32xf32>
    %55 = vector.shape_cast %54 : vector<1x32xf32> to vector<1x1x32xf32>
    %56 = vector.broadcast %53 : vector<2x8x1xf32> to vector<2x8x32xf32>
    %57 = vector.broadcast %55 : vector<1x1x32xf32> to vector<2x8x32xf32>
    %58 = arith.mulf %56, %57 : vector<2x8x32xf32>
    %59 = arith.addf %32, %58 : vector<2x8x32xf32>
    %c1 = arith.constant 1 : index
    %c0_24 = arith.constant 0 : index
    %c0_25 = arith.constant 0 : index
    %60 = vector.load %arg5[%c1, %c0_24, %c0_25] : memref<4x1x32xbf16, #tpu.memory_space<vmem>>, vector<1x1x32xbf16>
    %61 = vector.shape_cast %60 : vector<1x1x32xbf16> to vector<1x32xbf16>
    %62 = vector.shape_cast %61 : vector<1x32xbf16> to vector<1x1x32xbf16>
    %63 = vector.broadcast %62 : vector<1x1x32xbf16> to vector<2x8x32xbf16>
    %64 = arith.mulf %26, %63 : vector<2x8x32xbf16>
    "tpu.trace_start"() <{level = 10 : i32, message = "bte,bse->bts"}> : () -> ()
    %cst_26 = arith.constant dense<0.000000e+00> : vector<2x8x8xf32>
    %65 = tpu.matmul %64, %28, %cst_26 {dimension_numbers = #tpu.dot_dimension_numbers<[2], [2], [1], [1], [0, 0, 0, 1, 1, 1], [0], [0]>} : vector<2x8x32xbf16>, vector<2x8x32xbf16>, vector<2x8x8xf32> -> vector<2x8x8xf32>
    "tpu.trace_stop"() : () -> ()
    %cst_27 = arith.constant 0.353553385 : f32
    %66 = vector.broadcast %cst_27 : f32 to vector<2x8x8xf32>
    %67 = arith.mulf %65, %66 : vector<2x8x8xf32>
    %cst_28 = arith.constant dense<0xFF800000> : vector<2x8xf32>
    %68 = vector.multi_reduction <maximumf>, %67, %cst_28 [2] : vector<2x8x8xf32> to vector<2x8xf32>
    %69 = vector.shape_cast %68 : vector<2x8xf32> to vector<2x8x1xf32>
    %70 = vector.broadcast %69 : vector<2x8x1xf32> to vector<2x8x8xf32>
    %71 = arith.subf %67, %70 : vector<2x8x8xf32>
    %72 = math.exp %71 : vector<2x8x8xf32>
    %73 = arith.truncf %72 : vector<2x8x8xf32> to vector<2x8x8xbf16>
    %74 = vector.shape_cast %61 : vector<1x32xbf16> to vector<1x1x32xbf16>
    %75 = vector.broadcast %74 : vector<1x1x32xbf16> to vector<2x8x32xbf16>
    %76 = arith.mulf %30, %75 : vector<2x8x32xbf16>
    "tpu.trace_start"() <{level = 10 : i32, message = "bts,bse->bte"}> : () -> ()
    %cst_29 = arith.constant dense<0.000000e+00> : vector<2x8x32xf32>
    %77 = tpu.matmul %73, %76, %cst_29 {dimension_numbers = #tpu.dot_dimension_numbers<[2], [1], [1], [2], [0, 0, 0, 1, 1, 2], [0], [0]>} : vector<2x8x8xbf16>, vector<2x8x32xbf16>, vector<2x8x32xf32> -> vector<2x8x32xf32>
    "tpu.trace_stop"() : () -> ()
    %78 = arith.addf %51, %77 : vector<2x8x32xf32>
    %cst_30 = arith.constant dense<0.000000e+00> : vector<2x8xf32>
    %79 = vector.multi_reduction <add>, %72, %cst_30 [2] : vector<2x8x8xf32> to vector<2x8xf32>
    %80 = vector.shape_cast %79 : vector<2x8xf32> to vector<2x8x1xf32>
    %81 = arith.extf %61 : vector<1x32xbf16> to vector<1x32xf32>
    %82 = vector.shape_cast %81 : vector<1x32xf32> to vector<1x1x32xf32>
    %83 = vector.broadcast %80 : vector<2x8x1xf32> to vector<2x8x32xf32>
    %84 = vector.broadcast %82 : vector<1x1x32xf32> to vector<2x8x32xf32>
    %85 = arith.mulf %83, %84 : vector<2x8x32xf32>
    %86 = arith.addf %59, %85 : vector<2x8x32xf32>
    %c2 = arith.constant 2 : index
    %c0_31 = arith.constant 0 : index
    %c0_32 = arith.constant 0 : index
    %87 = vector.load %arg5[%c2, %c0_31, %c0_32] : memref<4x1x32xbf16, #tpu.memory_space<vmem>>, vector<1x1x32xbf16>
    %88 = vector.shape_cast %87 : vector<1x1x32xbf16> to vector<1x32xbf16>
    %89 = vector.shape_cast %88 : vector<1x32xbf16> to vector<1x1x32xbf16>
    %90 = vector.broadcast %89 : vector<1x1x32xbf16> to vector<2x8x32xbf16>
    %91 = arith.mulf %26, %90 : vector<2x8x32xbf16>
    "tpu.trace_start"() <{level = 10 : i32, message = "bte,bse->bts"}> : () -> ()
    %cst_33 = arith.constant dense<0.000000e+00> : vector<2x8x8xf32>
    %92 = tpu.matmul %91, %28, %cst_33 {dimension_numbers = #tpu.dot_dimension_numbers<[2], [2], [1], [1], [0, 0, 0, 1, 1, 1], [0], [0]>} : vector<2x8x32xbf16>, vector<2x8x32xbf16>, vector<2x8x8xf32> -> vector<2x8x8xf32>
    "tpu.trace_stop"() : () -> ()
    %cst_34 = arith.constant 0.353553385 : f32
    %93 = vector.broadcast %cst_34 : f32 to vector<2x8x8xf32>
    %94 = arith.mulf %92, %93 : vector<2x8x8xf32>
    %cst_35 = arith.constant dense<0xFF800000> : vector<2x8xf32>
    %95 = vector.multi_reduction <maximumf>, %94, %cst_35 [2] : vector<2x8x8xf32> to vector<2x8xf32>
    %96 = vector.shape_cast %95 : vector<2x8xf32> to vector<2x8x1xf32>
    %97 = vector.broadcast %96 : vector<2x8x1xf32> to vector<2x8x8xf32>
    %98 = arith.subf %94, %97 : vector<2x8x8xf32>
    %99 = math.exp %98 : vector<2x8x8xf32>
    %100 = arith.truncf %99 : vector<2x8x8xf32> to vector<2x8x8xbf16>
    %101 = vector.shape_cast %88 : vector<1x32xbf16> to vector<1x1x32xbf16>
    %102 = vector.broadcast %101 : vector<1x1x32xbf16> to vector<2x8x32xbf16>
    %103 = arith.mulf %30, %102 : vector<2x8x32xbf16>
    "tpu.trace_start"() <{level = 10 : i32, message = "bts,bse->bte"}> : () -> ()
    %cst_36 = arith.constant dense<0.000000e+00> : vector<2x8x32xf32>
    %104 = tpu.matmul %100, %103, %cst_36 {dimension_numbers = #tpu.dot_dimension_numbers<[2], [1], [1], [2], [0, 0, 0, 1, 1, 2], [0], [0]>} : vector<2x8x8xbf16>, vector<2x8x32xbf16>, vector<2x8x32xf32> -> vector<2x8x32xf32>
    "tpu.trace_stop"() : () -> ()
    %105 = arith.addf %78, %104 : vector<2x8x32xf32>
    %cst_37 = arith.constant dense<0.000000e+00> : vector<2x8xf32>
    %106 = vector.multi_reduction <add>, %99, %cst_37 [2] : vector<2x8x8xf32> to vector<2x8xf32>
    %107 = vector.shape_cast %106 : vector<2x8xf32> to vector<2x8x1xf32>
    %108 = arith.extf %88 : vector<1x32xbf16> to vector<1x32xf32>
    %109 = vector.shape_cast %108 : vector<1x32xf32> to vector<1x1x32xf32>
    %110 = vector.broadcast %107 : vector<2x8x1xf32> to vector<2x8x32xf32>
    %111 = vector.broadcast %109 : vector<1x1x32xf32> to vector<2x8x32xf32>
    %112 = arith.mulf %110, %111 : vector<2x8x32xf32>
    %113 = arith.addf %86, %112 : vector<2x8x32xf32>
    %c3 = arith.constant 3 : index
    %c0_38 = arith.constant 0 : index
    %c0_39 = arith.constant 0 : index
    %114 = vector.load %arg5[%c3, %c0_38, %c0_39] : memref<4x1x32xbf16, #tpu.memory_space<vmem>>, vector<1x1x32xbf16>
    %115 = vector.shape_cast %114 : vector<1x1x32xbf16> to vector<1x32xbf16>
    %116 = vector.shape_cast %115 : vector<1x32xbf16> to vector<1x1x32xbf16>
    %117 = vector.broadcast %116 : vector<1x1x32xbf16> to vector<2x8x32xbf16>
    %118 = arith.mulf %26, %117 : vector<2x8x32xbf16>
    "tpu.trace_start"() <{level = 10 : i32, message = "bte,bse->bts"}> : () -> ()
    %cst_40 = arith.constant dense<0.000000e+00> : vector<2x8x8xf32>
    %119 = tpu.matmul %118, %28, %cst_40 {dimension_numbers = #tpu.dot_dimension_numbers<[2], [2], [1], [1], [0, 0, 0, 1, 1, 1], [0], [0]>} : vector<2x8x32xbf16>, vector<2x8x32xbf16>, vector<2x8x8xf32> -> vector<2x8x8xf32>
    "tpu.trace_stop"() : () -> ()
    %cst_41 = arith.constant 0.353553385 : f32
    %120 = vector.broadcast %cst_41 : f32 to vector<2x8x8xf32>
    %121 = arith.mulf %119, %120 : vector<2x8x8xf32>
    %cst_42 = arith.constant dense<0xFF800000> : vector<2x8xf32>
    %122 = vector.multi_reduction <maximumf>, %121, %cst_42 [2] : vector<2x8x8xf32> to vector<2x8xf32>
    %123 = vector.shape_cast %122 : vector<2x8xf32> to vector<2x8x1xf32>
    %124 = vector.broadcast %123 : vector<2x8x1xf32> to vector<2x8x8xf32>
    %125 = arith.subf %121, %124 : vector<2x8x8xf32>
    %126 = math.exp %125 : vector<2x8x8xf32>
    %127 = arith.truncf %126 : vector<2x8x8xf32> to vector<2x8x8xbf16>
    %128 = vector.shape_cast %115 : vector<1x32xbf16> to vector<1x1x32xbf16>
    %129 = vector.broadcast %128 : vector<1x1x32xbf16> to vector<2x8x32xbf16>
    %130 = arith.mulf %30, %129 : vector<2x8x32xbf16>
    "tpu.trace_start"() <{level = 10 : i32, message = "bts,bse->bte"}> : () -> ()
    %cst_43 = arith.constant dense<0.000000e+00> : vector<2x8x32xf32>
    %131 = tpu.matmul %127, %130, %cst_43 {dimension_numbers = #tpu.dot_dimension_numbers<[2], [1], [1], [2], [0, 0, 0, 1, 1, 2], [0], [0]>} : vector<2x8x8xbf16>, vector<2x8x32xbf16>, vector<2x8x32xf32> -> vector<2x8x32xf32>
    "tpu.trace_stop"() : () -> ()
    %132 = arith.addf %105, %131 : vector<2x8x32xf32>
    %cst_44 = arith.constant dense<0.000000e+00> : vector<2x8xf32>
    %133 = vector.multi_reduction <add>, %126, %cst_44 [2] : vector<2x8x8xf32> to vector<2x8xf32>
    %134 = vector.shape_cast %133 : vector<2x8xf32> to vector<2x8x1xf32>
    %135 = arith.extf %115 : vector<1x32xbf16> to vector<1x32xf32>
    %136 = vector.shape_cast %135 : vector<1x32xf32> to vector<1x1x32xf32>
    %137 = vector.broadcast %134 : vector<2x8x1xf32> to vector<2x8x32xf32>
    %138 = vector.broadcast %136 : vector<1x1x32xf32> to vector<2x8x32xf32>
    %139 = arith.mulf %137, %138 : vector<2x8x32xf32>
    %140 = arith.addf %113, %139 : vector<2x8x32xf32>
    %141 = tpu.reciprocal %140 {approx = true} : vector<2x8x32xf32> -> vector<2x8x32xf32>
    %142 = arith.mulf %132, %141 : vector<2x8x32xf32>
    %143 = vector.shape_cast %142 : vector<2x8x32xf32> to vector<16x32xf32>
    %144 = arith.addf %143, %1 : vector<16x32xf32>
    %cst_45 = arith.constant dense<0.000000e+00> : vector<16xf32>
    %145 = vector.multi_reduction <add>, %144, %cst_45 [1] : vector<16x32xf32> to vector<16xf32>
    %146 = vector.shape_cast %145 : vector<16xf32> to vector<16x1xf32>
    %cst_46 = arith.constant 3.200000e+01 : f32
    %147 = vector.broadcast %cst_46 : f32 to vector<16x1xf32>
    %148 = arith.divf %146, %147 : vector<16x1xf32>
    %149 = vector.broadcast %148 : vector<16x1xf32> to vector<16x32xf32>
    %150 = arith.subf %144, %149 : vector<16x32xf32>
    %151 = arith.mulf %150, %150 : vector<16x32xf32>
    %cst_47 = arith.constant dense<0.000000e+00> : vector<16xf32>
    %152 = vector.multi_reduction <add>, %151, %cst_47 [1] : vector<16x32xf32> to vector<16xf32>
    %153 = vector.shape_cast %152 : vector<16xf32> to vector<16x1xf32>
    %cst_48 = arith.constant 3.200000e+01 : f32
    %154 = vector.broadcast %cst_48 : f32 to vector<16x1xf32>
    %155 = arith.divf %153, %154 : vector<16x1xf32>
    %cst_49 = arith.constant 9.99999974E-6 : f32
    %156 = vector.broadcast %cst_49 : f32 to vector<16x1xf32>
    %157 = arith.addf %155, %156 : vector<16x1xf32>
    %158 = math.rsqrt %157 : vector<16x1xf32>
    %159 = vector.broadcast %158 : vector<16x1xf32> to vector<16x32xf32>
    %160 = arith.mulf %150, %159 : vector<16x32xf32>
    %161 = arith.truncf %160 : vector<16x32xf32> to vector<16x32xbf16>
    %c0_50 = arith.constant 0 : index
    %c0_51 = arith.constant 0 : index
    %162 = vector.load %arg6[%c0_50, %c0_51] : memref<32x64xbf16, #tpu.memory_space<vmem>>, vector<32x64xbf16>
    %cst_52 = arith.constant dense<0.000000e+00> : vector<16x64xf32>
    %163 = tpu.matmul %161, %162, %cst_52 {dimension_numbers = #tpu.dot_dimension_numbers<[1], [0], [0], [1], [0, 0, 1, 1], [], []>} : vector<16x32xbf16>, vector<32x64xbf16>, vector<16x64xf32> -> vector<16x64xf32>
    %c0_53 = arith.constant 0 : index
    %c0_54 = arith.constant 0 : index
    %164 = vector.load %arg7[%c0_53, %c0_54] : memref<1x64xf32, #tpu.memory_space<vmem>>, vector<1x64xf32>
    %165 = vector.broadcast %164 : vector<1x64xf32> to vector<16x64xf32>
    %166 = arith.addf %163, %165 : vector<16x64xf32>
    %cst_55 = arith.constant 5.000000e-01 : f32
    %167 = vector.broadcast %cst_55 : f32 to vector<16x64xf32>
    %168 = arith.mulf %167, %166 : vector<16x64xf32>
    %cst_56 = arith.constant 4.471500e-02 : f32
    %169 = vector.broadcast %cst_56 : f32 to vector<16x64xf32>
    %170 = arith.mulf %169, %166 : vector<16x64xf32>
    %171 = arith.mulf %170, %166 : vector<16x64xf32>
    %172 = arith.mulf %171, %166 : vector<16x64xf32>
    %173 = arith.addf %166, %172 : vector<16x64xf32>
    %cst_57 = arith.constant 0.797884583 : f32
    %174 = vector.broadcast %cst_57 : f32 to vector<16x64xf32>
    %175 = arith.mulf %174, %173 : vector<16x64xf32>
    %176 = math.tanh %175 : vector<16x64xf32>
    %cst_58 = arith.constant 1.000000e+00 : f32
    %177 = vector.broadcast %cst_58 : f32 to vector<16x64xf32>
    %178 = arith.addf %177, %176 : vector<16x64xf32>
    %179 = arith.mulf %168, %178 : vector<16x64xf32>
    %180 = arith.truncf %179 : vector<16x64xf32> to vector<16x64xbf16>
    %c0_59 = arith.constant 0 : index
    %c0_60 = arith.constant 0 : index
    %181 = vector.load %arg8[%c0_59, %c0_60] : memref<64x32xbf16, #tpu.memory_space<vmem>>, vector<64x32xbf16>
    %cst_61 = arith.constant dense<0.000000e+00> : vector<16x32xf32>
    %182 = tpu.matmul %180, %181, %cst_61 {dimension_numbers = #tpu.dot_dimension_numbers<[1], [0], [0], [1], [0, 0, 1, 1], [], []>} : vector<16x64xbf16>, vector<64x32xbf16>, vector<16x32xf32> -> vector<16x32xf32>
    %c0_62 = arith.constant 0 : index
    %c0_63 = arith.constant 0 : index
    %183 = vector.load %arg9[%c0_62, %c0_63] : memref<1x32xf32, #tpu.memory_space<vmem>>, vector<1x32xf32>
    %184 = vector.broadcast %183 : vector<1x32xf32> to vector<16x32xf32>
    %185 = arith.addf %182, %184 : vector<16x32xf32>
    %186 = arith.addf %185, %144 : vector<16x32xf32>
    %187 = arith.truncf %186 : vector<16x32xf32> to vector<16x32xbf16>
    %c0_64 = arith.constant 0 : index
    %c0_65 = arith.constant 0 : index
    %188 = vector.load %arg10[%c0_64, %c0_65] : memref<16x32xbf16, #tpu.memory_space<vmem>>, vector<16x32xbf16>
    tpu.vector_store %arg10[%c0_64, %c0_65], %187 {strides = array<i32>} : memref<16x32xbf16, #tpu.memory_space<vmem>>, vector<16x32xbf16>,
    return
  }
  func.func @transform_0(%arg0: i32) -> (i32, i32) {
    %c0_i32 = arith.constant 0 : i32
    %c0_i32_0 = arith.constant 0 : i32
    return %arg0, %c0_i32 : i32, i32
  }
  func.func @transform_1(%arg0: i32) -> (i32, i32) {
    %c0_i32 = arith.constant 0 : i32
    %c0_i32_0 = arith.constant 0 : i32
    %c0_i32_1 = arith.constant 0 : i32
    return %c0_i32, %c0_i32_0 : i32, i32
  }
  func.func @transform_2(%arg0: i32) -> (i32, i32) {
    %c0_i32 = arith.constant 0 : i32
    %c0_i32_0 = arith.constant 0 : i32
    %c0_i32_1 = arith.constant 0 : i32
    return %c0_i32, %c0_i32_0 : i32, i32
  }
  func.func @transform_3(%arg0: i32) -> (i32, i32) {
    %c0_i32 = arith.constant 0 : i32
    %c0_i32_0 = arith.constant 0 : i32
    %c0_i32_1 = arith.constant 0 : i32
    return %c0_i32, %c0_i32_0 : i32, i32
  }
  func.func @transform_4(%arg0: i32) -> (i32, i32, i32) {
    %c0_i32 = arith.constant 0 : i32
    %c0_i32_0 = arith.constant 0 : i32
    %c0_i32_1 = arith.constant 0 : i32
    %c0_i32_2 = arith.constant 0 : i32
    return %c0_i32, %c0_i32_0, %c0_i32_1 : i32, i32, i32
  }
  func.func @transform_5(%arg0: i32) -> (i32, i32) {
    %c0_i32 = arith.constant 0 : i32
    %c0_i32_0 = arith.constant 0 : i32
    %c0_i32_1 = arith.constant 0 : i32
    return %c0_i32, %c0_i32_0 : i32, i32
  }
  func.func @transform_6(%arg0: i32) -> (i32, i32) {
    %c0_i32 = arith.constant 0 : i32
    %c0_i32_0 = arith.constant 0 : i32
    %c0_i32_1 = arith.constant 0 : i32
    return %c0_i32, %c0_i32_0 : i32, i32
  }
  func.func @transform_7(%arg0: i32) -> (i32, i32) {
    %c0_i32 = arith.constant 0 : i32
    %c0_i32_0 = arith.constant 0 : i32
    %c0_i32_1 = arith.constant 0 : i32
    return %c0_i32, %c0_i32_0 : i32, i32
  }
  func.func @transform_8(%arg0: i32) -> (i32, i32) {
    %c0_i32 = arith.constant 0 : i32
    %c0_i32_0 = arith.constant 0 : i32
    %c0_i32_1 = arith.constant 0 : i32
    return %c0_i32, %c0_i32_0 : i32, i32
  }
  func.func @transform_9(%arg0: i32) -> (i32, i32) {
    %c0_i32 = arith.constant 0 : i32
    %c0_i32_0 = arith.constant 0 : i32
    return %arg0, %c0_i32 : i32, i32
  }
}

</mosaic_0001>

<bundles_post_ra>
// kernel: tpu_custom_call.1
= control target key start
LH: loop header
LB: loop body
LE: loop exit
PB: predicated region body
PF: predicated region fallthrough
CT: control target
= control target key end

     0   :  { %14 = vsyncpa [#allocation3], 0  ;;  %s2214_s0 = inlined_call_operand.hbm [shape: bf16[16,32], index: 0, kind: input, shape index: {}]   ;;  %s2215_s1 = inlined_call_operand.vmem [shape: bf16[32,32], index: 1, kind: input, shape index: {}]   ;;  %s2216_s2 = inlined_call_operand.vmem [shape: bf16[32,32], index: 2, kind: input, shape index: {}]   ;;  %s2217_s3 = inlined_call_operand.vmem [shape: bf16[32,32], index: 3, kind: input, shape index: {}]   ;;  %s2218_s4 = inlined_call_operand.vmem [shape: bf16[4,1,32], index: 4, kind: input, shape index: {}]   ;;  %s2219_s5 = inlined_call_operand.vmem [shape: bf16[32,64], index: 5, kind: input, shape index: {}]   ;;  %s2220_s6 = inlined_call_operand.hbm [shape: f32[1,64], index: 6, kind: input, shape index: {}]   ;;  %s2221_s7 = inlined_call_operand.vmem [shape: bf16[64,32], index: 7, kind: input, shape index: {}]   ;;  %s2222_s8 = inlined_call_operand.vmem [shape: f32[1,32], index: 8, kind: input, shape index: {}]   ;;  %s2223_s9 = inlined_call_operand.hbm [shape: bf16[16,32], index: 9, kind: output, shape index: {}]  }
   0x1   :  { %15 = vsyncpa [#allocation6], 0 }
   0x2   :  { %16 = vsyncpa [#allocation4], 0  ;;  %s1816_s30 = smov [#allocation2]   ;;  %s1744_s13 = scalar_lea.hbm %s2214_s0, 128 }
   0x3   :  { %s22_s10 = sshll.u32 %s1816_s30, 4  ;;  %p1745_p0 = scmp.ne.s32.totalorder %s2214_s0, %s1744_s13  ;;  %s23_s10 = int_to_ptr.vmem [resolvable:$true] %s22_s10 }
   0x4   :  { %p1748_p1 = scmp.lt.u32.totalorder %s1744_s13, %s2214_s0 }
   0x6   :  { %p1750_p2 = pnand %p1748_p1, %p1745_p0 }
   0x8   :  { %1753 = shalt.err (!%p1750_p2)
}
   0x9   :  { %s1754_s18 = scalar_lea.vmem %s23_s10, 128  ;;  %p1759_p4 = scmp.lt.s32.totalorder %s23_s10, %s23_s10 }
   0xa   :  { %p1755_p3 = scmp.ne.s32.totalorder %s23_s10, %s1754_s18  ;;  %p1760_p5 = scmp.lt.s32.totalorder %s1754_s18, %s1754_s18 }
   0xc   :  { %p1761_p6 = por %p1760_p5, %p1759_p4 }
   0xe   :  { %p1762_p7 = pnand %p1761_p6, %p1755_p3 }
  0x10   :  { %1765 = shalt.err (!%p1762_p7)
}
  0x11   :  { %s1817_s19 = smov 64   ;;  %s1818_s20 = smov 4  }
  0x12   :  { %28 = dma.hbm_to_vmem [thread:$0]  %s2214_s0, 128, %s23_s10, [#allocation3], %s1817_s19, %s1817_s19, %s1818_s20  }
  0x13   :  { %s1819_s23 = smov [#allocation5]   ;;  %s1766_s27 = scalar_lea.hbm %s2220_s6, 16 }
  0x14   :  { %s45_s24 = sshll.u32 %s1819_s23, 4  ;;  %p1767_p8 = scmp.ne.s32.totalorder %s2220_s6, %s1766_s27  ;;  %s46_s24 = int_to_ptr.vmem [resolvable:$true] %s45_s24 }
  0x15   :  { %p1770_p9 = scmp.lt.u32.totalorder %s1766_s27, %s2220_s6 }
  0x17   :  { %p1772_p10 = pnand %p1770_p9, %p1767_p8 }
  0x19   :  { %1775 = shalt.err (!%p1772_p10)
}
  0x1a   :  { %s1776_s12 = scalar_lea.vmem %s46_s24, 16  ;;  %s1780_s0 = scalar_lea.vmem %s46_s24, 32 }
  0x1b   :  { %p1777_p11 = scmp.ne.s32.totalorder %s46_s24, %s1776_s12  ;;  %p1781_p12 = scmp.lt.s32.totalorder %s46_s24, %s46_s24 }
  0x1c   :  { %p1782_p13 = scmp.lt.s32.totalorder %s1780_s0, %s1776_s12 }
  0x1e   :  { %p1783_p0 = por %p1782_p13, %p1781_p12 }
  0x20   :  { %p1784_p1 = pnand %p1783_p0, %p1777_p11 }
  0x22   :  { %1787 = shalt.err (!%p1784_p1)
}
  0x23   :  { %48 = dma.hbm_to_vmem [thread:$0]  %s2220_s6, 16, %s46_s24, [#allocation6]  }
  0x24   :  { %1810 = dma.done.wait [#allocation3], 128  }
  0x25   :  { %1811 = vsyncadd [#allocation3], 4294967168 }
  0x26   :  { %1812 = dma.done.wait [#allocation6], 16  }
  0x27   :  { %1813 = vsyncadd [#allocation6], 4294967280  ;;  %v1477_v0 = vld [vmem:[#allocation2] sm:$0xff]   ;;  %vm64_vm0 = vcmask 261120   ;;  %v1820_v17 = vmov 0.0   ;;  %v1702_v18 = vld [vmem:[%s2215_s1 + $0x8] sm:$0xff]   ;;  %v293_v33 = vlaneseq }
  0x28   :  { %v1900_v1 = vunpack.c.l.bf16 %v1477_v0  ;;  %v1902_v2 = vunpack.c.h.bf16 %v1477_v0  ;;  %v1700_v15 = vld [vmem:[%s2215_s1] sm:$0xff]   ;;  %1529 = vmatprep.subr.bf16.mxu1 %v1820_v17  ;;  %1545 = vmatprep.subr.bf16.mxu0 %v1820_v17  ;;  %v1703_v19 = vld [vmem:[%s2217_s3 + $0x8] sm:$0xff]   ;;  %vm1821_vm1 = vmmov 0   ;;  %vm543_vm2 = vcmask 1043456   ;;  %s1822_s22 = smov [#allocation7]  }
  0x29   :  { %v1701_v16 = vld [vmem:[%s2217_s3] sm:$0xff]   ;;  %1530 = vmatpush3.bf16.msra.mxu1 %v1700_v15  ;;  %1533 = vmatprep.mubr.msk.bf16.mxu1 %vm1821_vm1, %v1820_v17  ;;  %v1705_v32 = vld [vmem:[%s2216_s2 + $0x8] sm:$0xff]   ;;  %v294_v34 = vshrl.u32 %v293_v33, 7  ;;  %vm393_vm3 = vcmask 64512   ;;  %vm1346_vm4 = vcmask 523264   ;;  %vm1401_vm5 = vcmask 257024  }
  0x2a   :  { %v65_v3 = vsel %vm64_vm0, %v1900_v1, 0.0  ;;  %v68_v4 = vsel %vm64_vm0, %v1902_v2, 0.0  ;;  %1546 = vmatpush3.bf16.msra.mxu0 %v1701_v16  ;;  %1531 = vmatprep.subr.bf16.mxu1 %v1820_v17  ;;  %v1704_v30 = vld [vmem:[%s2216_s2] sm:$0xff]   ;;  %s1409_s1 = sshll.u32 %s1822_s22, 4  ;;  %s1410_s1 = int_to_ptr.vmem [resolvable:$true] %s1409_s1 }
  0x2b   :  { %66 = vadd.xlane.f32.xlu0 %v65_v3  ;;  %1547 = vmatprep.subr.bf16.mxu0 %v1820_v17  ;;  %v1954_v35 = vld [vmem:[%s2218_s4] sm:$0x1]  ;;  %v1959_v36 = vld [vmem:[%s2218_s4 + $0x2] sm:$0x1]  ;;  %v1964_v37 = vld [vmem:[%s2218_s4 + $0x3] sm:$0x1]  ;;  %p1793_p3 = scmp.lt.s32.totalorder %s1410_s1, %s1410_s1 }
  0x2c   :  { %1549 = vmatprep.mubr.msk.bf16.mxu0 %vm1821_vm1, %v1820_v17  ;;  %v291_v38 = vpack.i.b16 %v1954_v35, %v1954_v35  ;;  %v1968_v39 = vsub.s32 0, %v294_v34  ;;  %v743_v40 = vpack.i.b16 %v1959_v36, %v1959_v36  ;;  %v967_v41 = vpack.i.b16 %v1964_v37, %v1964_v37  ;;  %s1788_s3 = scalar_lea.vmem %s1410_s1, 128 }
  0x2d   :  { %1532 = vmatpush3.bf16.msra.mxu1 %v1702_v18  ;;  %p1789_p2 = scmp.ne.s32.totalorder %s1410_s1, %s1788_s3  ;;  %p1794_p4 = scmp.lt.s32.totalorder %s1788_s3, %s1788_s3 }
  0x2e   :  { %1548 = vmatpush3.bf16.msra.mxu0 %v1703_v19  ;;  %1537 = vmatprep.subr.bf16.mxu1 %v1820_v17  ;;  %v296_v43 = vrot.slane %v291_v38, %v1968_v39  ;;  %v1976_v45 = vrot.slane %v743_v40, %v1968_v39  ;;  %v1979_v46 = vrot.slane %v967_v41, %v1968_v39 }
  0x2f   :  { %69 = vadd.xlane.f32.xlu0 %v68_v4  ;;  %1559 = vmatprep.subr.bf16.mxu0 %v1820_v17  ;;  %p1795_p5 = por %p1794_p4, %p1793_p3 }
  0x31   :  { %p1796_p6 = pnand %p1795_p5, %p1789_p2 }
  0xb8   :  { %v67_v5 = vpop.xlane.xlu0 %66 }
  0xb9   :  { %v72_v6 = vmul.f32 0.03125, %v67_v5 }
  0xbb   :  { %v74_v7 = vsub.f32 %v1900_v1, %v72_v6 }
  0xbc   :  { %v70_v8 = vpop.xlane.xlu0 %69 }
  0xbd   :  { %v73_v9 = vmul.f32 0.03125, %v70_v8  ;;  %v76_v10 = vmul.f32 %v74_v7, %v74_v7 }
  0xbf   :  { %v75_v11 = vsub.f32 %v1902_v2, %v73_v9  ;;  %v78_v12 = vsel %vm64_vm0, %v76_v10, 0.0 }
  0xc0   :  { %79 = vadd.xlane.f32.xlu1 %v78_v12  ;;  %v2009_v12 = vld [vmem:[%s2218_s4 + $0x1] sm:$0x1] }
  0xc1   :  { %v77_v13 = vmul.f32 %v75_v11, %v75_v11  ;;  %v428_v15 = vpack.i.b16 %v2009_v12, %v2009_v12 }
  0xc3   :  { %v81_v14 = vsel %vm64_vm0, %v77_v13, 0.0  ;;  %v433_v19 = vrot.slane %v428_v15, %v1968_v39 }
  0xc4   :  { %82 = vadd.xlane.f32.xlu1 %v81_v14 }
 0x14d   :  { %v80_v20 = vpop.xlane.xlu1 %79 }
 0x14e   :  { %v84_v21 = vmul.f32 0.03125, %v80_v20 }
 0x150   :  { %v86_v22 = vadd.f32 1e-05, %v84_v21 }
 0x151   :  { %v83_v23 = vpop.xlane.xlu1 %82 }
 0x152   :  { %v85_v24 = vmul.f32 0.03125, %v83_v23  ;;  %1712 = vrsqrt.f32 %v86_v22 }
 0x154   :  { %v87_v25 = vadd.f32 1e-05, %v85_v24 }
 0x156   :  { %1714 = vrsqrt.f32 %v87_v25 }
 0x15c   :  { %v1713_v26 = vpop.eup %1712 }
 0x15d   :  { %v90_v28 = vmul.f32 %v1713_v26, %v74_v7 }
 0x160   :  { %v1715_v27 = vpop.eup %1714 }
 0x161   :  { %v91_v29 = vmul.f32 %v1715_v27, %v75_v11 }
 0x163   :  { %v92_v31 = vpack.c.bf16 %v91_v29, %v90_v28 }
 0x165   :  { %1534 = vmatmul.mubr.msk.bf16.vlgmr.msra.gmra.mrb[0].mxu1 %vm64_vm0, %v92_v31  ;;  %1550 = vmatmul.mubr.msk.bf16.vlgmr.msra.gmra.mrb[0].mxu0 %vm64_vm0, %v92_v31 }
 0x166   :  { %1538 = vmatpush3.bf16.msra.mxu1 %v1704_v30  ;;  %1541 = vmatprep.mubr.msk.bf16.mxu1 %vm1821_vm1, %v1820_v17 }
 0x167   :  { %1539 = vmatprep.subr.bf16.mxu1 %v1820_v17  ;;  %1561 = vmatprep.mubr.msk.bf16.mxu0 %vm1821_vm1, %v1820_v17 }
 0x16a   :  { %1540 = vmatpush3.bf16.msra.mxu1 %v1705_v32 }
 0x16b   :  { %1553 = vmatprep.subr.bf16.mxu1 %v1820_v17 }
 0x16d   :  { %1542 = vmatmul.mubr.msk.bf16.vlgmr.msra.gmra.mrb[4].mxu1 %vm64_vm0, %v92_v31 }
 0x16e   :  { %1555 = vmatprep.mubr.msk.bf16.mxu1 %vm1821_vm1, %v1820_v17 }
 0x238   :  { %v146_v42 = vpop.f32.mrb[0].mxu1  ;;  %v260_v44 = vpop.f32.mrb[0].mxu0 }
 0x239   :  { %v1472_v47 = vpack.c.bf16 %v260_v44, %v260_v44  ;;  %v1535_v48 = vpop.f32.mrb[1].mxu1  ;;  %v1551_v49 = vpop.f32.mrb[1].mxu0  ;;  %v2012_v13 = vpack.c.bf16 %v146_v42, %v146_v42 }
 0x23a   :  { %v149_v50 = vpop.f32.mrb[2].mxu1  ;;  %v263_v51 = vpop.f32.mrb[2].mxu0 }
 0x23b   :  { %v1536_v52 = vpop.f32.mrb[3].mxu1  ;;  %v1552_v53 = vpop.f32.mrb[3].mxu0  ;;  %v1473_v54 = vpack.c.bf16 %v263_v51, %v263_v51  ;;  %v408_v55 = vmul.bf16 %v1472_v47, %v296_v43  ;;  %v853_v56 = vmul.bf16 %v1472_v47, %v1976_v45  ;;  %v1077_v57 = vmul.bf16 %v1472_v47, %v1979_v46 }
 0x23c   :  { %v2021_v16 = vpack.c.bf16 %v149_v50, %v149_v50  ;;  %v297_v18 = vmul.bf16 %v2012_v13, %v296_v43  ;;  %v538_v21 = vmul.bf16 %v1472_v47, %v433_v19  ;;  %v434_v22 = vmul.bf16 %v2012_v13, %v433_v19 }
 0x23d   :  { %v1984_v58 = vsel %vm543_vm2, %v408_v55, 0  ;;  %v409_v59 = vmul.bf16 %v1473_v54, %v296_v43  ;;  %v1987_v61 = vsel %vm543_vm2, %v853_v56, 0  ;;  %v854_v62 = vmul.bf16 %v1473_v54, %v1976_v45 }
 0x23e   :  { %v1991_v63 = vsel %vm543_vm2, %v1077_v57, 0  ;;  %v1078_v0 = vmul.bf16 %v1473_v54, %v1979_v46  ;;  %v298_v20 = vmul.bf16 %v2021_v16, %v296_v43  ;;  %v539_v23 = vmul.bf16 %v1473_v54, %v433_v19 }
 0x23f   :  { %v1995_v5 = vsel %vm543_vm2, %v409_v59, 0  ;;  %v1998_v7 = vsel %vm543_vm2, %v854_v62, 0  ;;  %v435_v24 = vmul.bf16 %v2021_v16, %v433_v19  ;;  %v545_v25 = vsel %vm543_vm2, %v538_v21, 0 }
 0x240   :  { %v203_v60 = vpop.f32.mrb[4].mxu1  ;;  %v2001_v8 = vsel %vm543_vm2, %v1078_v0, 0  ;;  %v591_v26 = vsel %vm543_vm2, %v539_v23, 0 }
 0x241   :  { %v1470_v3 = vpack.c.bf16 %v203_v60, %v203_v60  ;;  %v1543_v4 = vpop.f32.mrb[5].mxu1 }
 0x242   :  { %v206_v6 = vpop.f32.mrb[6].mxu1 }
 0x243   :  { %v2004_v9 = vsel %vm64_vm0, %v1470_v3, 0  ;;  %v1471_v10 = vpack.c.bf16 %v206_v6, %v206_v6  ;;  %v1544_v11 = vpop.f32.mrb[7].mxu1 }
 0x244   :  { %1554 = vmatpush3.bf16.xpose.msra.mxu1 %v2004_v9 }
 0x245   :  { %v2015_v14 = vsel %vm64_vm0, %v1471_v10, 0  ;;  %1565 = vmatprep.subr.bf16.mxu1 %v1820_v17 }
 0x246   :  { %1560 = vmatpush3.bf16.xpose.msra.mxu0 %v2015_v14 }
 0x247   :  { %1571 = vmatprep.subr.bf16.mxu0 %v1820_v17 }
 0x24b   :  { %1556 = vmatmul.mubr.msk.bf16.vlgmr.msra.gmra.mrb[8].mxu1 %vm64_vm0, %v297_v18 }
 0x24c   :  { %1566 = vmatpush3.bf16.xpose.msra.mxu1 %v2004_v9  ;;  %1567 = vmatprep.mubr.msk.bf16.mxu1 %vm1821_vm1, %v1820_v17 }
 0x24d   :  { %1562 = vmatmul.mubr.msk.bf16.vlgmr.msra.gmra.mrb[4].mxu0 %vm64_vm0, %v298_v20  ;;  %1577 = vmatprep.subr.bf16.mxu1 %v1820_v17 }
 0x24e   :  { %1572 = vmatpush3.bf16.xpose.msra.mxu0 %v2015_v14  ;;  %1573 = vmatprep.mubr.msk.bf16.mxu0 %vm1821_vm1, %v1820_v17 }
 0x24f   :  { %1583 = vmatprep.subr.bf16.mxu0 %v1820_v17 }
 0x253   :  { %1568 = vmatmul.mubr.msk.bf16.vlgmr.msra.gmra.mrb[12].mxu1 %vm64_vm0, %v434_v22 }
 0x254   :  { %1578 = vmatpush3.bf16.msra.mxu1 %v545_v25  ;;  %1579 = vmatprep.mubr.msk.bf16.mxu1 %vm1821_vm1, %v1820_v17 }
 0x255   :  { %1574 = vmatmul.mubr.msk.bf16.vlgmr.msra.gmra.mrb[8].mxu0 %vm64_vm0, %v435_v24  ;;  %1589 = vmatprep.subr.bf16.mxu1 %v1820_v17 }
 0x256   :  { %1584 = vmatpush3.bf16.msra.mxu0 %v591_v26  ;;  %1585 = vmatprep.mubr.msk.bf16.mxu0 %vm1821_vm1, %v1820_v17  ;;  %v750_v26 = vmul.bf16 %v2021_v16, %v1976_v45 }
 0x257   :  { %1595 = vmatprep.subr.bf16.mxu0 %v1820_v17 }
 0x31e   :  { %v339_v27 = vpop.f32.mrb[8].mxu1 }
 0x31f   :  { %v1557_v28 = vpop.f32.mrb[9].mxu1  ;;  %v391_v42 = vmul.f32 0.35355338, %v339_v27 }
 0x320   :  { %v342_v29 = vpop.f32.mrb[10].mxu1  ;;  %v385_v30 = vpop.f32.mrb[4].mxu0 }
 0x321   :  { %v1558_v31 = vpop.f32.mrb[11].mxu1  ;;  %v1563_v32 = vpop.f32.mrb[5].mxu0  ;;  %v392_v52 = vmul.f32 0.35355338, %v385_v30  ;;  %v394_v55 = vsel %vm393_vm3, %v391_v42, -inf }
 0x322   :  { %v388_v33 = vpop.f32.mrb[6].mxu0 }
 0x323   :  { %v1564_v34 = vpop.f32.mrb[7].mxu0  ;;  %v397_v56 = vsel %vm393_vm3, %v392_v52, -inf }
 0x326   :  { %v473_v38 = vpop.f32.mrb[12].mxu1 }
 0x327   :  { %v522_v40 = vmul.f32 0.35355338, %v473_v38  ;;  %v1569_v41 = vpop.f32.mrb[13].mxu1 }
 0x328   :  { %v476_v43 = vpop.f32.mrb[14].mxu1  ;;  %v516_v44 = vpop.f32.mrb[8].mxu0 }
 0x329   :  { %v523_v47 = vmul.f32 0.35355338, %v516_v44  ;;  %v1570_v48 = vpop.f32.mrb[15].mxu1  ;;  %v1575_v49 = vpop.f32.mrb[9].mxu0  ;;  %v524_v50 = vsel %vm393_vm3, %v522_v40, -inf }
 0x32a   :  { %v519_v51 = vpop.f32.mrb[10].mxu0  ;;  %525 = vmax.xlane.f32.xlu0 %v524_v50 }
 0x32b   :  { %v1576_v53 = vpop.f32.mrb[11].mxu0  ;;  %v527_v54 = vsel %vm393_vm3, %v523_v47, -inf }
 0x32c   :  { %528 = vmax.xlane.f32.xlu1 %v527_v54 }
 0x32e   :  { %395 = vmax.xlane.f32.xlu0 %v394_v55 }
 0x330   :  { %398 = vmax.xlane.f32.xlu1 %v397_v56 }
 0x3b7   :  { %v526_v57 = vpop.xlane.xlu0 %525 }
 0x3b8   :  { %v530_v59 = vsub.f32 %v522_v40, %v526_v57 }
 0x3b9   :  { %v529_v60 = vpop.xlane.xlu1 %528 }
 0x3ba   :  { %v532_v62 = vmul.f32 1.442695, %v530_v59  ;;  %v531_v0 = vsub.f32 %v523_v47, %v529_v60 }
 0x3bb   :  { %v396_v3 = vpop.xlane.xlu0 %395 }
 0x3bc   :  { %1716 = vpow2.f32 %v532_v62  ;;  %v534_v4 = vmul.f32 1.442695, %v531_v0  ;;  %v400_v10 = vsub.f32 %v391_v42, %v396_v3 }
 0x3bd   :  { %v399_v6 = vpop.xlane.xlu1 %398 }
 0x3be   :  { %1718 = vpow2.f32 %v534_v4  ;;  %v401_v11 = vsub.f32 %v392_v52, %v399_v6  ;;  %v402_v15 = vmul.f32 1.442695, %v400_v10  ;;  %v973_v52 = vmul.bf16 %v2012_v13, %v1979_v46 }
 0x3c0   :  { %v404_v18 = vmul.f32 1.442695, %v401_v11  ;;  %1720 = vpow2.f32 %v402_v15 }
 0x3c2   :  { %1722 = vpow2.f32 %v404_v18 }
 0x3c6   :  { %v2053_v19 = vpop.eup %1716 }
 0x3c7   :  { %v536_v20 = vpack.c.bf16 %v2053_v19, %v2053_v19  ;;  %v725_v0 = vsel %vm393_vm3, %v2053_v19, 0.0 }
 0x3c8   :  { %v2057_v21 = vpop.eup %1718 }
 0x3c9   :  { %1580 = vmatmul.mubr.msk.bf16.vlgmr.msra.gmra.mrb[16].mxu1 %vm393_vm3, %v536_v20  ;;  %v537_v22 = vpack.c.bf16 %v2057_v21, %v2057_v21  ;;  %v728_v3 = vsel %vm393_vm3, %v2057_v21, 0.0 }
 0x3ca   :  { %1590 = vmatpush3.bf16.msra.mxu1 %v1984_v58  ;;  %1591 = vmatprep.mubr.msk.bf16.mxu1 %vm1821_vm1, %v1820_v17  ;;  %v2071_v23 = vpop.eup %1720 }
 0x3cb   :  { %1586 = vmatmul.mubr.msk.bf16.vlgmr.msra.gmra.mrb[12].mxu0 %vm393_vm3, %v537_v22  ;;  %1601 = vmatprep.subr.bf16.mxu1 %v1820_v17  ;;  %v406_v58 = vpack.c.bf16 %v2071_v23, %v2071_v23  ;;  %v410_v60 = vsel %vm393_vm3, %v2071_v23, 0.0 }
 0x3cc   :  { %1596 = vmatpush3.bf16.msra.mxu0 %v1995_v5  ;;  %1597 = vmatprep.mubr.msk.bf16.mxu0 %vm1821_vm1, %v1820_v17  ;;  %v2073_v24 = vpop.eup %1722  ;;  %v749_v5 = vmul.bf16 %v2012_v13, %v1976_v45 }
 0x3cd   :  { %1607 = vmatprep.subr.bf16.mxu0 %v1820_v17  ;;  %v407_v25 = vpack.c.bf16 %v2073_v24, %v2073_v24  ;;  %v413_v62 = vsel %vm393_vm3, %v2073_v24, 0.0 }
 0x3d5   :  { %1592 = vmatmul.mubr.msk.bf16.vlgmr.msra.gmra.mrb[16].mxu1 %vm393_vm3, %v406_v58 }
 0x3d6   :  { %1602 = vmatpush3.bf16.xpose.msra.mxu1 %v2004_v9  ;;  %1603 = vmatprep.mubr.msk.bf16.mxu1 %vm1821_vm1, %v1820_v17 }
 0x3d7   :  { %1598 = vmatmul.mubr.msk.bf16.vlgmr.msra.gmra.mrb[12].mxu0 %vm393_vm3, %v407_v25  ;;  %1613 = vmatprep.subr.bf16.mxu1 %v1820_v17 }
 0x3d8   :  { %1608 = vmatpush3.bf16.xpose.msra.mxu0 %v2015_v14  ;;  %1609 = vmatprep.mubr.msk.bf16.mxu0 %vm1821_vm1, %v1820_v17 }
 0x3d9   :  { %1619 = vmatprep.subr.bf16.mxu0 %v1820_v17 }
 0x3dd   :  { %1604 = vmatmul.mubr.msk.bf16.vlgmr.msra.gmra.mrb[20].mxu1 %vm64_vm0, %v749_v5 }
 0x3de   :  { %1614 = vmatpush3.bf16.msra.mxu1 %v1987_v61  ;;  %1615 = vmatprep.mubr.msk.bf16.mxu1 %vm1821_vm1, %v1820_v17 }
 0x3df   :  { %1610 = vmatmul.mubr.msk.bf16.vlgmr.msra.gmra.mrb[16].mxu0 %vm64_vm0, %v750_v26  ;;  %1625 = vmatprep.subr.bf16.mxu1 %v1820_v17 }
 0x3e0   :  { %1620 = vmatpush3.bf16.msra.mxu0 %v1998_v7  ;;  %1621 = vmatprep.mubr.msk.bf16.mxu0 %vm1821_vm1, %v1820_v17 }
 0x3e1   :  { %1631 = vmatprep.subr.bf16.mxu0 %v1820_v17 }
 0x4b0   :  { %v788_v27 = vpop.f32.mrb[20].mxu1 }
 0x4b1   :  { %v837_v45 = vmul.f32 0.35355338, %v788_v27  ;;  %v1605_v28 = vpop.f32.mrb[21].mxu1 }
 0x4b2   :  { %v791_v29 = vpop.f32.mrb[22].mxu1  ;;  %v831_v30 = vpop.f32.mrb[16].mxu0 }
 0x4b3   :  { %v838_v61 = vmul.f32 0.35355338, %v831_v30  ;;  %v1606_v31 = vpop.f32.mrb[23].mxu1  ;;  %v1611_v32 = vpop.f32.mrb[17].mxu0  ;;  %v839_v33 = vsel %vm393_vm3, %v837_v45, -inf  ;;  %v416_v29 = vunpack.c.l.bf16 %v1954_v35  ;;  %v955_v30 = vunpack.c.l.bf16 %v1959_v36 }
 0x4b4   :  { %v834_v34 = vpop.f32.mrb[18].mxu0  ;;  %840 = vmax.xlane.f32.xlu0 %v839_v33  ;;  %v1179_v31 = vunpack.c.l.bf16 %v1964_v37 }
 0x4b5   :  { %v1612_v38 = vpop.f32.mrb[19].mxu0  ;;  %v842_v7 = vsel %vm393_vm3, %v838_v61, -inf  ;;  %v420_v33 = vrot.slane %v416_v29, %v1968_v39  ;;  %v959_v34 = vrot.slane %v955_v30, %v1968_v39  ;;  %v1708_v30 = vld [vmem:[%s2221_s7] sm:$0xff]  }
 0x4b6   :  { %843 = vmax.xlane.f32.xlu1 %v842_v7 }
 0x541   :  { %v841_v40 = vpop.xlane.xlu0 %840 }
 0x542   :  { %v845_v41 = vsub.f32 %v837_v45, %v841_v40  ;;  %v731_v45 = vunpack.c.l.bf16 %v2009_v12  ;;  %v1183_v40 = vrot.slane %v1179_v31, %v1968_v39  ;;  %v1710_v31 = vld [vmem:[%s2221_s7 + $0x10] sm:$0xff]  }
 0x543   :  { %v844_v42 = vpop.xlane.xlu1 %843 }
 0x544   :  { %v847_v43 = vmul.f32 1.442695, %v845_v41  ;;  %v846_v44 = vsub.f32 %v838_v61, %v844_v42  ;;  %v735_v61 = vrot.slane %v731_v45, %v1968_v39 }
 0x546   :  { %1724 = vpow2.f32 %v847_v43  ;;  %v849_v47 = vmul.f32 1.442695, %v846_v44 }
 0x548   :  { %1726 = vpow2.f32 %v849_v47 }
 0x550   :  { %v1725_v48 = vpop.eup %1724 }
 0x551   :  { %v851_v49 = vpack.c.bf16 %v1725_v48, %v1725_v48  ;;  %v949_v4 = vsel %vm393_vm3, %v1725_v48, 0.0 }
 0x552   :  { %v1727_v50 = vpop.eup %1726 }
 0x553   :  { %1616 = vmatmul.mubr.msk.bf16.vlgmr.msra.gmra.mrb[16].mxu1 %vm393_vm3, %v851_v49  ;;  %v852_v51 = vpack.c.bf16 %v1727_v50, %v1727_v50  ;;  %v952_v6 = vsel %vm393_vm3, %v1727_v50, 0.0 }
 0x554   :  { %1626 = vmatpush3.bf16.xpose.msra.mxu1 %v2004_v9  ;;  %1627 = vmatprep.mubr.msk.bf16.mxu1 %vm1821_vm1, %v1820_v17  ;;  %v974_v9 = vmul.bf16 %v2021_v16, %v1979_v46 }
 0x555   :  { %1622 = vmatmul.mubr.msk.bf16.vlgmr.msra.gmra.mrb[12].mxu0 %vm393_vm3, %v852_v51  ;;  %1637 = vmatprep.subr.bf16.mxu1 %v1820_v17 }
 0x556   :  { %1632 = vmatpush3.bf16.xpose.msra.mxu0 %v2015_v14  ;;  %1633 = vmatprep.mubr.msk.bf16.mxu0 %vm1821_vm1, %v1820_v17 }
 0x557   :  { %1643 = vmatprep.subr.bf16.mxu0 %v1820_v17 }
 0x55b   :  { %1628 = vmatmul.mubr.msk.bf16.vlgmr.msra.gmra.mrb[24].mxu1 %vm64_vm0, %v973_v52 }
 0x55c   :  { %1638 = vmatpush3.bf16.msra.mxu1 %v1991_v63  ;;  %1639 = vmatprep.mubr.msk.bf16.mxu1 %vm1821_vm1, %v1820_v17 }
 0x55d   :  { %1634 = vmatmul.mubr.msk.bf16.vlgmr.msra.gmra.mrb[20].mxu0 %vm64_vm0, %v974_v9  ;;  %1649 = vmatprep.subr.bf16.mxu1 %v1820_v17 }
 0x55e   :  { %1644 = vmatpush3.bf16.msra.mxu0 %v2001_v8  ;;  %1645 = vmatprep.mubr.msk.bf16.mxu0 %vm1821_vm1, %v1820_v17 }
 0x55f   :  { %1657 = vmatprep.subr.bf16.mxu0 %v1820_v17 }
 0x62e   :  { %v1012_v13 = vpop.f32.mrb[24].mxu1 }
 0x62f   :  { %v1061_v46 = vmul.f32 0.35355338, %v1012_v13  ;;  %v1629_v14 = vpop.f32.mrb[25].mxu1 }
 0x630   :  { %v1015_v16 = vpop.f32.mrb[26].mxu1  ;;  %v1055_v53 = vpop.f32.mrb[20].mxu0 }
 0x631   :  { %v1062_v63 = vmul.f32 0.35355338, %v1055_v53  ;;  %v1630_v54 = vpop.f32.mrb[27].mxu1  ;;  %v1635_v55 = vpop.f32.mrb[21].mxu0  ;;  %v1063_v56 = vsel %vm393_vm3, %v1061_v46, -inf }
 0x632   :  { %v1058_v57 = vpop.f32.mrb[22].mxu0  ;;  %1064 = vmax.xlane.f32.xlu0 %v1063_v56 }
 0x633   :  { %v1636_v59 = vpop.f32.mrb[23].mxu0  ;;  %v1066_v8 = vsel %vm393_vm3, %v1062_v63, -inf }
 0x634   :  { %1067 = vmax.xlane.f32.xlu1 %v1066_v8 }
 0x636   :  { %411 = vadd.xlane.f32.xlu0 %v410_v60 }
 0x638   :  { %414 = vadd.xlane.f32.xlu1 %v413_v62 }
 0x63a   :  { %726 = vadd.xlane.f32.xlu0 %v725_v0 }
 0x63c   :  { %729 = vadd.xlane.f32.xlu1 %v728_v3 }
 0x63e   :  { %950 = vadd.xlane.f32.xlu0 %v949_v4 }
 0x640   :  { %953 = vadd.xlane.f32.xlu1 %v952_v6 }
 0x6bf   :  { %v1065_v10 = vpop.xlane.xlu0 %1064 }
 0x6c0   :  { %v1069_v11 = vsub.f32 %v1061_v46, %v1065_v10 }
 0x6c1   :  { %v1068_v15 = vpop.xlane.xlu1 %1067 }
 0x6c2   :  { %v1071_v18 = vmul.f32 1.442695, %v1069_v11  ;;  %v1070_v20 = vsub.f32 %v1062_v63, %v1068_v15 }
 0x6c3   :  { %v412_v5 = vpop.xlane.xlu0 %411 }
 0x6c4   :  { %1728 = vpow2.f32 %v1071_v18  ;;  %v1073_v22 = vmul.f32 1.442695, %v1070_v20  ;;  %v421_v12 = vmul.f32 %v420_v33, %v412_v5 }
 0x6c5   :  { %v415_v26 = vpop.xlane.xlu1 %414 }
 0x6c6   :  { %1730 = vpow2.f32 %v1073_v22  ;;  %v422_v44 = vmul.f32 %v420_v33, %v415_v26  ;;  %v1706_v22 = vld [vmem:[%s2219_s5] sm:$0xff]   ;;  %v1456_v33 = vld [vmem:[#allocation5] ss:$0 sm:$0xff] }
 0x6c7   :  { %v727_v27 = vpop.xlane.xlu0 %726 }
 0x6c8   :  { %v736_v7 = vmul.f32 %v735_v61, %v727_v27 }
 0x6c9   :  { %v730_v28 = vpop.xlane.xlu1 %729 }
 0x6ca   :  { %v737_v42 = vmul.f32 %v735_v61, %v730_v28  ;;  %v738_v36 = vadd.f32 %v736_v7, %v421_v12  ;;  %v1709_v61 = vld [vmem:[%s2221_s7 + $0x8] sm:$0xff]  }
 0x6cb   :  { %v951_v32 = vpop.xlane.xlu0 %950 }
 0x6cc   :  { %v960_v43 = vmul.f32 %v959_v34, %v951_v32  ;;  %v739_v49 = vadd.f32 %v737_v42, %v422_v44  ;;  %v1711_v32 = vld [vmem:[%s2221_s7 + $0x18] sm:$0xff]  }
 0x6cd   :  { %v954_v38 = vpop.xlane.xlu1 %953 }
 0x6ce   :  { %v1729_v19 = vpop.eup %1728  ;;  %v961_v47 = vmul.f32 %v959_v34, %v954_v38  ;;  %v962_v37 = vadd.f32 %v960_v43, %v738_v36 }
 0x6cf   :  { %v1173_v23 = vsel %vm393_vm3, %v1729_v19, 0.0  ;;  %v1075_v24 = vpack.c.bf16 %v1729_v19, %v1729_v19  ;;  %v1707_v19 = vld [vmem:[%s2219_s5 + $0x8] sm:$0xff]  }
 0x6d0   :  { %v1731_v21 = vpop.eup %1730  ;;  %1174 = vadd.xlane.f32.xlu0 %v1173_v23  ;;  %v963_v51 = vadd.f32 %v961_v47, %v739_v49 }
 0x6d1   :  { %1640 = vmatmul.mubr.msk.bf16.vlgmr.msra.gmra.mrb[16].mxu1 %vm393_vm3, %v1075_v24  ;;  %v1176_v58 = vsel %vm393_vm3, %v1731_v21, 0.0  ;;  %v1076_v25 = vpack.c.bf16 %v1731_v21, %v1731_v21 }
 0x6d2   :  { %1177 = vadd.xlane.f32.xlu1 %v1176_v58  ;;  %1653 = vmatprep.mubr.msk.bf16.mxu1 %vm1821_vm1, %v1820_v17 }
 0x6d3   :  { %1646 = vmatmul.mubr.msk.bf16.vlgmr.msra.gmra.mrb[12].mxu0 %vm393_vm3, %v1076_v25  ;;  %1650 = vmatpush3.bf16.msra.mxu1 %v1706_v22 }
 0x6d4   :  { %1665 = vmatprep.mubr.msk.bf16.mxu0 %vm1821_vm1, %v1820_v17  ;;  %1651 = vmatprep.subr.bf16.mxu1 %v1820_v17 }
 0x6d5   :  { %1658 = vmatpush3.bf16.msra.mxu0 %v1708_v30 }
 0x6d6   :  { %1659 = vmatprep.subr.bf16.mxu0 %v1820_v17 }
 0x6d7   :  { %1652 = vmatpush3.bf16.msra.mxu1 %v1707_v19 }
 0x6d9   :  { %1660 = vmatpush3.bf16.msra.mxu0 %v1709_v61 }
 0x6da   :  { %1661 = vmatprep.subr.bf16.mxu0 %v1820_v17 }
 0x6dd   :  { %1662 = vmatpush3.bf16.msra.mxu0 %v1710_v31 }
 0x6de   :  { %1663 = vmatprep.subr.bf16.mxu0 %v1820_v17 }
 0x6e1   :  { %1664 = vmatpush3.bf16.msra.mxu0 %v1711_v32 }
 0x75d   :  { %v1175_v41 = vpop.xlane.xlu0 %1174 }
 0x75e   :  { %v1184_v48 = vmul.f32 %v1183_v40, %v1175_v41 }
 0x75f   :  { %v1178_v35 = vpop.xlane.xlu1 %1177 }
 0x760   :  { %v1185_v50 = vmul.f32 %v1183_v40, %v1178_v35  ;;  %v1186_v52 = vadd.f32 %v1184_v48, %v962_v37 }
 0x762   :  { %v1187_v9 = vadd.f32 %v1185_v50, %v963_v51  ;;  %1732 = vrcp.f32 %v1186_v52 }
 0x764   :  { %1734 = vrcp.f32 %v1187_v9 }
 0x76c   :  { %v1733_v13 = vpop.eup %1732 }
 0x76e   :  { %v1735_v16 = vpop.eup %1734 }
 0x7a4   :  { %v1119_v46 = vpop.f32.mrb[16].mxu1 }
 0x7a5   :  { %v1190_v39 = vmul.f32 %v1733_v13, %v1119_v46  ;;  %v1641_v14 = vpop.f32.mrb[17].mxu1 }
 0x7a6   :  { %v1122_v53 = vpop.f32.mrb[18].mxu1  ;;  %v1165_v63 = vpop.f32.mrb[12].mxu0 }
 0x7a7   :  { %v2158_v54 = vadd.f32 %v1900_v1, %v1190_v39  ;;  %v1191_v55 = vmul.f32 %v1735_v16, %v1165_v63  ;;  %v1642_v56 = vpop.f32.mrb[19].mxu1  ;;  %v1647_v57 = vpop.f32.mrb[13].mxu0  ;;  %v1460_v53 = vld [vmem:[%s2222_s8] ss:$0 sm:$0xff] }
 0x7a8   :  { %v1168_v59 = vpop.f32.mrb[14].mxu0 }
 0x7a9   :  { %v2161_v8 = vadd.f32 %v1902_v2, %v1191_v55  ;;  %v1648_v60 = vpop.f32.mrb[15].mxu0  ;;  %v1194_v62 = vsel %vm64_vm0, %v2158_v54, 0.0 }
 0x7aa   :  { %1195 = vadd.xlane.f32.xlu0 %v1194_v62 }
 0x7ab   :  { %v1197_v0 = vsel %vm64_vm0, %v2161_v8, 0.0 }
 0x7ac   :  { %1198 = vadd.xlane.f32.xlu1 %v1197_v0 }
 0x837   :  { %v1196_v3 = vpop.xlane.xlu0 %1195 }
 0x838   :  { %v1200_v4 = vmul.f32 0.03125, %v1196_v3 }
 0x839   :  { %v1199_v1 = vpop.xlane.xlu1 %1198 }
 0x83a   :  { %v1202_v6 = vsub.f32 %v2158_v54, %v1200_v4  ;;  %v1201_v10 = vmul.f32 0.03125, %v1199_v1 }
 0x83c   :  { %v1203_v11 = vsub.f32 %v2161_v8, %v1201_v10  ;;  %v1204_v15 = vmul.f32 %v1202_v6, %v1202_v6 }
 0x83e   :  { %v1206_v2 = vsel %vm64_vm0, %v1204_v15, 0.0  ;;  %v1205_v18 = vmul.f32 %v1203_v11, %v1203_v11 }
 0x83f   :  { %1207 = vadd.xlane.f32.xlu0 %v1206_v2 }
 0x840   :  { %v1209_v20 = vsel %vm64_vm0, %v1205_v18, 0.0 }
 0x841   :  { %1210 = vadd.xlane.f32.xlu1 %v1209_v20 }
 0x8cc   :  { %v1208_v23 = vpop.xlane.xlu0 %1207 }
 0x8cd   :  { %v1212_v24 = vmul.f32 0.03125, %v1208_v23 }
 0x8ce   :  { %v1211_v21 = vpop.xlane.xlu1 %1210 }
 0x8cf   :  { %v1214_v58 = vadd.f32 1e-05, %v1212_v24  ;;  %v1213_v25 = vmul.f32 0.03125, %v1211_v21 }
 0x8d1   :  { %1736 = vrsqrt.f32 %v1214_v58  ;;  %v1215_v5 = vadd.f32 1e-05, %v1213_v25 }
 0x8d3   :  { %1738 = vrsqrt.f32 %v1215_v5 }
 0x8db   :  { %v1737_v26 = vpop.eup %1736 }
 0x8dc   :  { %v1218_v45 = vmul.f32 %v1737_v26, %v1202_v6 }
 0x8dd   :  { %v1739_v27 = vpop.eup %1738 }
 0x8de   :  { %v1219_v28 = vmul.f32 %v1739_v27, %v1203_v11 }
 0x8e0   :  { %v1220_v29 = vpack.c.bf16 %v1219_v28, %v1218_v45 }
 0x8e2   :  { %1654 = vmatmul.mubr.msk.bf16.vlgmr.msra.gmra.mrb[28].mxu1 %vm64_vm0, %v1220_v29 }
 0x9b5   :  { %v1281_v34 = vpop.f32.mrb[28].mxu1 }
 0x9b6   :  { %v1282_v38 = vadd.f32 %v1456_v33, %v1281_v34  ;;  %v1655_v7 = vpop.f32.mrb[29].mxu1 }
 0x9b7   :  { %v1284_v40 = vpop.f32.mrb[30].mxu1 }
 0x9b8   :  { %v1290_v41 = vmul.f32 0.044715, %v1282_v38  ;;  %v1285_v12 = vadd.f32 %v1456_v33, %v1284_v40  ;;  %v1656_v42 = vpop.f32.mrb[31].mxu1  ;;  %v1288_v9 = vmul.f32 0.5, %v1282_v38 }
 0x9ba   :  { %v1292_v43 = vmul.f32 %v1290_v41, %v1282_v38  ;;  %v1291_v35 = vmul.f32 0.044715, %v1285_v12  ;;  %v1289_v13 = vmul.f32 0.5, %v1285_v12 }
 0x9bc   :  { %v1294_v44 = vmul.f32 %v1292_v43, %v1282_v38  ;;  %v1293_v36 = vmul.f32 %v1291_v35, %v1285_v12 }
 0x9be   :  { %v1296_v47 = vadd.f32 %v1294_v44, %v1282_v38  ;;  %v1295_v48 = vmul.f32 %v1293_v36, %v1285_v12 }
 0x9c0   :  { %v1298_v49 = vmul.f32 0.7978846, %v1296_v47  ;;  %v1297_v37 = vadd.f32 %v1295_v48, %v1285_v12 }
 0x9c2   :  { %1740 = vtanh.f32 %v1298_v49  ;;  %v1299_v50 = vmul.f32 0.7978846, %v1297_v37 }
 0x9c4   :  { %1742 = vtanh.f32 %v1299_v50 }
 0x9cc   :  { %v1741_v17 = vpop.eup %1740 }
 0x9cd   :  { %v1302_v51 = vadd.f32 1.0, %v1741_v17 }
 0x9ce   :  { %v1743_v52 = vpop.eup %1742 }
 0x9cf   :  { %v1303_v46 = vadd.f32 1.0, %v1743_v52  ;;  %v1304_v39 = vmul.f32 %v1302_v51, %v1288_v9 }
 0x9d1   :  { %v1305_v14 = vmul.f32 %v1303_v46, %v1289_v13 }
 0x9d3   :  { %v1306_v16 = vpack.c.bf16 %v1305_v14, %v1304_v39 }
 0x9d5   :  { %1666 = vmatmul.mubr.msk.bf16.vlgmr.msra.gmra.mrb[24].mxu0 %vm1346_vm4, %v1306_v16 }
 0xaa8   :  { %v1384_v63 = vpop.f32.mrb[24].mxu0 }
 0xaa9   :  { %v1385_v55 = vadd.f32 %v1460_v53, %v1384_v63  ;;  %v1667_v56 = vpop.f32.mrb[25].mxu0 }
 0xaaa   :  { %v1387_v57 = vpop.f32.mrb[26].mxu0 }
 0xaab   :  { %v1391_v59 = vadd.f32 %v1385_v55, %v2158_v54  ;;  %v1388_v60 = vadd.f32 %v1460_v53, %v1387_v57  ;;  %v1668_v62 = vpop.f32.mrb[27].mxu0 }
 0xaad   :  { %v1474_v0 = vpack.c.bf16 %v1391_v59, %v1391_v59  ;;  %v1392_v3 = vadd.f32 %v1388_v60, %v2161_v8 }
 0xaaf   :  { %v1475_v4 = vpack.c.bf16 %v1392_v3, %v1392_v3  ;;  %1402 = vst.msk [vmem:[#allocation7] sm:$0xf] %vm1401_vm5, %v1474_v0 }
 0xab1   :  { %1403 = vst.msk [vmem:[#allocation7 + $0x4] sm:$0xf] %vm1401_vm5, %v1475_v4 }
 0xab2   :  { %1799 = shalt.err (!%p1796_p6)
}
 0xab3   :  { %s1800_s24 = scalar_lea.hbm %s2223_s9, 128 }
 0xab4   :  { %p1801_p7 = scmp.ne.s32.totalorder %s2223_s9, %s1800_s24  ;;  %p1804_p8 = scmp.lt.u32.totalorder %s1800_s24, %s2223_s9 }
 0xab6   :  { %p1806_p9 = pnand %p1804_p8, %p1801_p7 }
 0xab8   :  { %1809 = shalt.err (!%p1806_p9)
}
 0xab9   :  { %1415 = dma.vmem_to_hbm [thread:$0]  %s1410_s1, 128, %s2223_s9, [#allocation4], %s1817_s19, %s1817_s19, %s1818_s20  }
 0xaba   :  { %1814 = dma.done.wait [#allocation4], 128  }
 0xabb   :  { %1815 = vsyncadd [#allocation4], 4294967168 }
 0xabc   :  { %1419 = vsyncpa [#allocation3], 1 }
 0xabd   :  { %1420 = vsyncpa [#allocation6], 1 }
 0xabe   :  { %1421 = vsyncpa [#allocation4], 1 }

</bundles_post_ra>
